<compile_context>
chip_gen: v7x
topology: tpu7x:2x2x1
jax: 0.10.0
libtpu: 0.0.40
codegen_flags: <defaults>
</compile_context>

<pallas_src>
import jax
import jax.numpy as jnp
from jax.experimental import pallas as pl
from jax.experimental.pallas import tpu as pltpu


def _exp_regression_kernel(params_ref, x_ref, o_ref):
    # params_ref lives in SMEM: [a, log_b]
    a = params_ref[0]
    log_b = params_ref[1]
    # a * b^x  ==  a * exp(log_b * x)   (one EUP transcendental per element)
    o_ref[...] = a * jnp.exp(log_b * x_ref[...])


def exp_regression_forward(x, a, log_b, *, block_rows=512, lane_width=1024):
    """Elementwise  a * exp(log_b)^x  for an arbitrarily shaped float array x.

    The wrapper flattens x, pads it to a lane-dense (rows, lane_width) slab
    (lane_width a large multiple of 128 -> unmasked vst stores), runs the
    kernel over large blocks, then undoes the padding/reshape.
    """
    orig_shape = x.shape
    orig_dtype = x.dtype

    flat = x.reshape(-1).astype(jnp.float32)
    n = flat.shape[0]

    padded = pl.cdiv(n, lane_width) * lane_width
    if padded != n:
        flat = jnp.pad(flat, (0, padded - n))
    rows = padded // lane_width
    x2d = flat.reshape(rows, lane_width)

    # Large blocks to amortize the ~0.35 us per-grid-step overhead.
    # 512 x 1024 f32 = 2 MiB/block; with in+out double-buffered that is ~8 MiB,
    # safely inside the default scoped-VMEM limit on v5e/v6e/v7x.
    # Block shape must be (8,128)-divisible OR equal to the full array dims.
    tile_rows = block_rows if rows >= block_rows else rows
    grid = (pl.cdiv(rows, tile_rows),)

    params = jnp.stack(
        [jnp.asarray(a, jnp.float32).reshape(()),
         jnp.asarray(log_b, jnp.float32).reshape(())]
    )  # shape (2,), goes to SMEM

    out2d = pl.pallas_call(
        _exp_regression_kernel,
        out_shape=jax.ShapeDtypeStruct((rows, lane_width), jnp.float32),
        grid=grid,
        in_specs=[
            # scalar parameters: whole (2,) vector in SMEM, same for every tile
            pl.BlockSpec(memory_space=pltpu.MemorySpace.SMEM),
            pl.BlockSpec((tile_rows, lane_width), lambda i: (i, 0)),
        ],
        out_specs=pl.BlockSpec((tile_rows, lane_width), lambda i: (i, 0)),
        compiler_params=pltpu.CompilerParams(
            dimension_semantics=("parallel",),
        ),
        cost_estimate=pl.CostEstimate(
            flops=2 * padded,
            transcendentals=padded,
            bytes_accessed=8 * padded,
        ),
    )(params, x2d)

    out = out2d.reshape(-1)[:n].reshape(orig_shape).astype(orig_dtype)
    return out


def exp_regression_ref(x, a, log_b):
    b = jnp.exp(log_b)
    return a * jnp.power(b, x)


if __name__ == "__main__":
    key = jax.random.PRNGKey(0)
    kx, ka, kb, kx2 = jax.random.split(key, 4)

    # Parameters: nn.Parameter(torch.randn(1)) -> scalar float32 each.
    a = jax.random.normal(ka, ()).astype(jnp.float32)
    log_b = jax.random.normal(kb, ()).astype(jnp.float32)

    # Small example input (elementwise op, arbitrary X shape).
    x = jax.random.normal(kx, (2, 4, 16, 16), dtype=jnp.float32)

    out = exp_regression_forward(x, a, log_b)
    out = jax.block_until_ready(out)

    ref = exp_regression_ref(x, a, log_b)
    assert out.shape == ref.shape and out.dtype == ref.dtype
    assert jnp.allclose(out, ref, rtol=1e-4, atol=1e-6), "mismatch vs reference"

    # Secondary check: ragged size (exercises the pad/unpad path).
    x2 = jax.random.normal(kx2, (37, 5), dtype=jnp.float32)
    out2 = jax.block_until_ready(exp_regression_forward(x2, a, log_b))
    ref2 = exp_regression_ref(x2, a, log_b)
    assert jnp.allclose(out2, ref2, rtol=1e-4, atol=1e-6), "ragged mismatch"

    print("KERNEL_OK")
</pallas_src>

<mosaic_0001>
module attributes {stable_mosaic.version = 11 : i64} {
  func.func @_exp_regression_kernel(%arg0: i32, %arg1: memref<2xf32, #tpu.memory_space<smem>>, %arg2: memref<2x1024xf32, #tpu.memory_space<vmem>>, %arg3: memref<2x1024xf32, #tpu.memory_space<vmem>>) attributes {dimension_semantics = [#tpu.dimension_semantics<parallel>], iteration_bounds = array<i64: 1>, scalar_prefetch = 0 : i64, scratch_operands = 0 : i64, tpu.core_type = #tpu.core_type<tc>, window_params = [{transform_indices = @transform_0, window_bounds = array<i64: 2>}, {transform_indices = @transform_1, window_bounds = array<i64: 2, 1024>}, {transform_indices = @transform_2, window_bounds = array<i64: 2, 1024>}]} {
    %c0 = arith.constant 0 : index
    %0 = memref.load %arg1[%c0] : memref<2xf32, #tpu.memory_space<smem>>
    %c1 = arith.constant 1 : index
    %1 = memref.load %arg1[%c1] : memref<2xf32, #tpu.memory_space<smem>>
    %c0_0 = arith.constant 0 : index
    %c0_1 = arith.constant 0 : index
    %2 = vector.load %arg2[%c0_0, %c0_1] : memref<2x1024xf32, #tpu.memory_space<vmem>>, vector<2x1024xf32>
    %3 = vector.broadcast %1 : f32 to vector<2x1024xf32>
    %4 = arith.mulf %3, %2 : vector<2x1024xf32>
    %5 = math.exp %4 : vector<2x1024xf32>
    %6 = vector.broadcast %0 : f32 to vector<2x1024xf32>
    %7 = arith.mulf %6, %5 : vector<2x1024xf32>
    %c0_2 = arith.constant 0 : index
    %c0_3 = arith.constant 0 : index
    %8 = vector.load %arg3[%c0_2, %c0_3] : memref<2x1024xf32, #tpu.memory_space<vmem>>, vector<2x1024xf32>
    tpu.vector_store %arg3[%c0_2, %c0_3], %7 {strides = array<i32>} : memref<2x1024xf32, #tpu.memory_space<vmem>>, vector<2x1024xf32>,
    return
  }
  func.func @transform_0(%arg0: i32) -> i32 {
    %c0_i32 = arith.constant 0 : i32
    %c0_i32_0 = arith.constant 0 : i32
    return %c0_i32 : i32
  }
  func.func @transform_1(%arg0: i32) -> (i32, i32) {
    %c0_i32 = arith.constant 0 : i32
    %c0_i32_0 = arith.constant 0 : i32
    return %arg0, %c0_i32 : i32, i32
  }
  func.func @transform_2(%arg0: i32) -> (i32, i32) {
    %c0_i32 = arith.constant 0 : i32
    %c0_i32_0 = arith.constant 0 : i32
    return %arg0, %c0_i32 : i32, i32
  }
}

</mosaic_0001>

<bundles_post_ra>
// kernel: tpu_custom_call.1
= control target key start
LH: loop header
LB: loop body
LE: loop exit
PB: predicated region body
PF: predicated region fallthrough
CT: control target
= control target key end

     0   :  { %7 = vsyncpa [#allocation5], 0  ;;  %s189_s0 = inlined_call_operand.hbm [shape: f32[2], index: 0, kind: input, shape index: {}]   ;;  %s190_s1 = inlined_call_operand.hbm [shape: f32[2,1024], index: 1, kind: input, shape index: {}]   ;;  %s191_s2 = inlined_call_operand.hbm [shape: f32[2,1024], index: 2, kind: output, shape index: {}]  }
   0x1   :  { %8 = vsyncpa [#allocation3], 0 }
   0x2   :  { %9 = vsyncpa [#allocation4], 0  ;;  %s75_s11 = scalar_lea.hbm %s189_s0, 16 }
   0x3   :  { %p76_p0 = scmp.ne.s32.totalorder %s189_s0, %s75_s11  ;;  %p79_p1 = scmp.lt.u32.totalorder %s75_s11, %s189_s0 }
   0x5   :  { %p81_p2 = pnand %p79_p1, %p76_p0 }
   0x7   :  { %84 = shalt.err (!%p81_p2)
}
   0x8   :  { %s135_s16 = smov [#allocation2]   ;;  %s136_s19 = smov [#allocation6]  }
   0x9   :  { %17 = dma.hbm_to_smem %s189_s0, 16, %s135_s16, [#allocation5]  }
   0xa   :  { %s24_s20 = sshll.u32 %s136_s19, 4  ;;  %s85_s23 = scalar_lea.hbm %s190_s1, 256  ;;  %s25_s20 = int_to_ptr.vmem [resolvable:$true] %s24_s20 }
   0xb   :  { %p86_p3 = scmp.ne.s32.totalorder %s190_s1, %s85_s23  ;;  %p89_p4 = scmp.lt.u32.totalorder %s85_s23, %s190_s1 }
   0xd   :  { %p91_p5 = pnand %p89_p4, %p86_p3 }
   0xf   :  { %94 = shalt.err (!%p91_p5)
}
  0x10   :  { %s95_s28 = scalar_lea.vmem %s25_s20, 256  ;;  %p100_p7 = scmp.lt.s32.totalorder %s25_s20, %s25_s20 }
  0x11   :  { %p96_p6 = scmp.ne.s32.totalorder %s25_s20, %s95_s28  ;;  %p101_p8 = scmp.lt.s32.totalorder %s95_s28, %s95_s28 }
  0x13   :  { %p102_p9 = por %p101_p8, %p100_p7 }
  0x15   :  { %p103_p10 = pnand %p102_p9, %p96_p6 }
  0x17   :  { %106 = shalt.err (!%p103_p10)
}
  0x18   :  { %27 = dma.hbm_to_vmem [thread:$0]  %s190_s1, 256, %s25_s20, [#allocation3]  }
  0x19   :  { %129 = dma.done.wait [#allocation5], 16  }
  0x1a   :  { %130 = vsyncadd [#allocation5], 4294967280 }
  0x1b   :  { %131 = dma.done.wait [#allocation3], 256  }
  0x1c   :  { %132 = vsyncadd [#allocation3], 4294967040 }
  0x1d   :  { %34 = sfence }
  0x1e   :  { %s67_s30 = sld [smem:[#allocation2 + $0x1]]  ;;  %v37_v0 = vld [vmem:[#allocation6] sm:$0xff]  ;;  %v38_v1 = vld [vmem:[#allocation6 + $0x8] sm:$0xff]  ;;  %s35_s3 = sld [smem:[#allocation2]] }
  0x1f   :  { %s137_s4 = smov [#allocation7]  }
  0x20   :  { %s57_s5 = sshll.u32 %s137_s4, 4  ;;  %s58_s5 = int_to_ptr.vmem [resolvable:$true] %s57_s5 }
  0x21   :  { %s107_s1 = scalar_lea.vmem %s58_s5, 256  ;;  %p112_p12 = scmp.lt.s32.totalorder %s58_s5, %s58_s5 }
  0x22   :  { %p108_p11 = scmp.ne.s32.totalorder %s58_s5, %s107_s1  ;;  %p113_p13 = scmp.lt.s32.totalorder %s107_s1, %s107_s1 }
  0x24   :  { %v39_v2 = vstv %s67_s30  ;;  %v46_v7 = vstv %s35_s3  ;;  %p114_p0 = por %p113_p13, %p112_p12 }
  0x25   :  { %v40_v3 = vmul.f32 %v39_v2, %v37_v0  ;;  %v41_v4 = vmul.f32 %v39_v2, %v38_v1 }
  0x26   :  { %p115_p1 = pnand %p114_p0, %p108_p11 }
  0x27   :  { %v42_v5 = vmul.f32 1.442695, %v40_v3  ;;  %v44_v6 = vmul.f32 1.442695, %v41_v4 }
  0x29   :  { %71 = vpow2.f32 %v42_v5 }
  0x2a   :  { %73 = vpow2.f32 %v44_v6 }
  0x33   :  { %v72_v8 = vpop.eup %71 }
  0x34   :  { %v74_v9 = vpop.eup %73  ;;  %v47_v10 = vmul.f32 %v72_v8, %v46_v7 }
  0x35   :  { %v48_v11 = vmul.f32 %v74_v9, %v46_v7 }
  0x36   :  { %49 = vst [vmem:[#allocation7] sm:$0xff] %v47_v10 }
  0x37   :  { %50 = vst [vmem:[#allocation7 + $0x8] sm:$0xff] %v48_v11 }
  0x38   :  { %118 = shalt.err (!%p115_p1)
}
  0x39   :  { %s119_s8 = scalar_lea.hbm %s191_s2, 256 }
  0x3a   :  { %p120_p2 = scmp.ne.s32.totalorder %s191_s2, %s119_s8  ;;  %p123_p3 = scmp.lt.u32.totalorder %s119_s8, %s191_s2 }
  0x3c   :  { %p125_p4 = pnand %p123_p3, %p120_p2 }
  0x3e   :  { %128 = shalt.err (!%p125_p4)
}
  0x3f   :  { %60 = dma.vmem_to_hbm [thread:$0]  %s58_s5, 256, %s191_s2, [#allocation4]  }
  0x40   :  { %133 = dma.done.wait [#allocation4], 256  }
  0x41   :  { %134 = vsyncadd [#allocation4], 4294967040 }
  0x42   :  { %64 = vsyncpa [#allocation3], 1 }
  0x43   :  { %65 = vsyncpa [#allocation4], 1 }
  0x44   :  { %66 = vsyncpa [#allocation5], 1 }

</bundles_post_ra>
